<compile_context>
chip_gen: v7x
topology: tpu7x:2x2x1
jax: 0.10.0
libtpu: 0.0.40
codegen_flags: <defaults>
</compile_context>

<pallas_src>
import jax
import jax.numpy as jnp
from jax.experimental import pallas as pl
from jax.experimental.pallas import tpu as pltpu

FEAT = 20  # feature dim from nn.Parameter(torch.rand(20, 20))


def _matmul_kernel(x_ref, w_ref, o_ref):
    # x_ref: (B, FEAT), w_ref: (FEAT, FEAT), o_ref: (B, FEAT) — all fully
    # resident in VMEM, single MXU pass with f32 accumulation.
    o_ref[...] = jnp.dot(
        x_ref[...], w_ref[...], preferred_element_type=jnp.float32
    ).astype(o_ref.dtype)


def my_modle_forward(x, weights1, weights2):
    """Pallas equivalent of MyModle's (implied) forward: (x @ w1) @ w2.

    The two parameter matrices are folded once (W = w1 @ w2, 20^3 FLOPs) so the
    kernel's critical path is a single x @ W matmul.
    """
    B, K = x.shape
    assert K == FEAT
    assert weights1.shape == (FEAT, FEAT) and weights2.shape == (FEAT, FEAT)

    # Fold the two weight matrices outside the kernel; amortized across calls.
    w = jnp.dot(weights1, weights2, preferred_element_type=jnp.float32).astype(x.dtype)

    # Shapes are tiny (20 is not a multiple of 128): gridless call, full-array
    # blocks pinned in VMEM — no grid pipeline, no per-step DMA machinery.
    return pl.pallas_call(
        _matmul_kernel,
        out_shape=jax.ShapeDtypeStruct((B, FEAT), x.dtype),
        in_specs=[
            pl.BlockSpec(memory_space=pltpu.MemorySpace.VMEM),
            pl.BlockSpec(memory_space=pltpu.MemorySpace.VMEM),
        ],
        out_specs=pl.BlockSpec(memory_space=pltpu.MemorySpace.VMEM),
    )(x, w)


if __name__ == "__main__":
    key = jax.random.PRNGKey(0)
    k_x, k_w1, k_w2 = jax.random.split(key, 3)

    # Deterministic parameter init matching torch.rand(20, 20) (uniform [0, 1)).
    weights1 = jax.random.uniform(k_w1, (FEAT, FEAT), dtype=jnp.float32)
    weights2 = jax.random.uniform(k_w2, (FEAT, FEAT), dtype=jnp.float32)

    # Small input consistent with the 20-feature weights: batch=8.
    x = jax.random.uniform(k_x, (8, FEAT), dtype=jnp.float32)

    fwd = jax.jit(my_modle_forward)
    out = fwd(x, weights1, weights2)
    jax.block_until_ready(out)

    # Sanity check against plain-JAX reference of the original two-matmul chain
    # (weight folding only changes f32 rounding order; tolerance absorbs it).
    ref = (x @ weights1) @ weights2
    assert out.shape == (8, FEAT)
    assert jnp.allclose(out, ref, atol=1e-4, rtol=1e-4)

    print("KERNEL_OK")
</pallas_src>

<mosaic_0001>
module attributes {stable_mosaic.version = 11 : i64} {
  func.func @_matmul_kernel(%arg0: memref<8x20xf32, #tpu.memory_space<vmem>>, %arg1: memref<20x20xf32, #tpu.memory_space<vmem>>, %arg2: memref<8x20xf32, #tpu.memory_space<vmem>>) attributes {dimension_semantics = [], scalar_prefetch = 0 : i64, scratch_operands = 0 : i64, tpu.core_type = #tpu.core_type<tc>} {
    %c0 = arith.constant 0 : index
    %c0_0 = arith.constant 0 : index
    %0 = vector.load %arg0[%c0, %c0_0] : memref<8x20xf32, #tpu.memory_space<vmem>>, vector<8x20xf32>
    %c0_1 = arith.constant 0 : index
    %c0_2 = arith.constant 0 : index
    %1 = vector.load %arg1[%c0_1, %c0_2] : memref<20x20xf32, #tpu.memory_space<vmem>>, vector<20x20xf32>
    %cst = arith.constant dense<0.000000e+00> : vector<8x20xf32>
    %2 = tpu.matmul %0, %1, %cst {dimension_numbers = #tpu.dot_dimension_numbers<[1], [0], [0], [1], [0, 0, 1, 1], [], []>} : vector<8x20xf32>, vector<20x20xf32>, vector<8x20xf32> -> vector<8x20xf32>
    %c0_3 = arith.constant 0 : index
    %c0_4 = arith.constant 0 : index
    %3 = vector.load %arg2[%c0_3, %c0_4] : memref<8x20xf32, #tpu.memory_space<vmem>>, vector<8x20xf32>
    tpu.vector_store %arg2[%c0_3, %c0_4], %2 {strides = array<i32>} : memref<8x20xf32, #tpu.memory_space<vmem>>, vector<8x20xf32>,
    return
  }
}

</mosaic_0001>

<bundles_post_ra>
// kernel: my_modle_forward.1
= control target key start
LH: loop header
LB: loop body
LE: loop exit
PB: predicated region body
PF: predicated region fallthrough
CT: control target
= control target key end

     0   :  { %v155_v2 = vmov 0.0|0.0   ;;  %s198_s0 = inlined_call_operand.vmem [shape: f32[8,20], index: 0, kind: input, shape index: {}]   ;;  %s199_s1 = inlined_call_operand.vmem [shape: f32[20,20], index: 1, kind: input, shape index: {}]   ;;  %s200_s2 = inlined_call_operand.hbm [shape: f32[8,20], index: 2, kind: output, shape index: {}]  }
   0x1   :  { %v13_v0 = vld [vmem:[%s199_s1] sm:$0xff]  ;;  %v14_v1 = vld [vmem:[%s199_s1 + $0x8] sm:$0xff]  ;;  %124 = vmatprep.subr.bf16.mxu0 %v155_v2 }
   0x2   :  { %v125_v3 = vpack.c.bf16 %v14_v1, %v13_v0 }
   0x3   :  { %7 = vsyncpa [#allocation3], 0  ;;  %vm156_vm0 = vmmov 0   ;;  %v157_v4 = vmov 0.0   ;;  %v15_v5 = vld [vmem:[%s199_s1 + $0x10] sm:$0xf] }
   0x4   :  { %121 = vmatprep.mubr.msk.f32.mxu0 %vm156_vm0, %v157_v4  ;;  %126 = vmatpush3.bf16.msra.mxu0 %v125_v3  ;;  %vm20_vm1 = vcmask 1043456   ;;  %v12_v6 = vld [vmem:[%s198_s0] sm:$0xff]  ;;  %vm16_vm2 = vcmask 162816   ;;  %s158_s17 = smov [#allocation2]  }
   0x5   :  { %119 = vmatprep.subr.mxu0 %v157_v4  ;;  %s101_s18 = sshll.u32 %s158_s17, 4  ;;  %s102_s18 = int_to_ptr.vmem [resolvable:$true] %s101_s18 }
   0x6   :  { %s131_s19 = scalar_lea.vmem %s102_s18, 128  ;;  %p136_p1 = scmp.lt.s32.totalorder %s102_s18, %s102_s18 }
   0x7   :  { %p132_p0 = scmp.ne.s32.totalorder %s102_s18, %s131_s19  ;;  %p137_p2 = scmp.lt.s32.totalorder %s131_s19, %s131_s19 }
   0x8   :  { %120 = vmatpush3.msk.msra.mxu0 %vm20_vm1, %v15_v5 }
   0x9   :  { %122 = vmatmul.mubr.msk.f32.vlgmr.msra.gmra.mrb[0].mxu0 %vm16_vm2, %v12_v6  ;;  %p138_p3 = por %p137_p2, %p136_p1 }
   0xb   :  { %p139_p4 = pnand %p138_p3, %p132_p0 }
  0xdc   :  { %v90_v7 = vpop.f32.mrb[0].mxu0 }
  0xdd   :  { %94 = vst.msk [vmem:[#allocation2] sm:$0xff] %vm16_vm2, %v90_v7  ;;  %v123_v8 = vpop.f32.mrb[1].mxu0 }
  0xde   :  { %142 = shalt.err (!%p139_p4)
}
  0xdf   :  { %s143_s0 = scalar_lea.hbm %s200_s2, 128 }
  0xe0   :  { %p144_p5 = scmp.ne.s32.totalorder %s200_s2, %s143_s0  ;;  %p147_p6 = scmp.lt.u32.totalorder %s143_s0, %s200_s2 }
  0xe2   :  { %p149_p7 = pnand %p147_p6, %p144_p5 }
  0xe4   :  { %152 = shalt.err (!%p149_p7)
}
  0xe5   :  { %104 = dma.vmem_to_hbm [thread:$0]  %s102_s18, 128, %s200_s2, [#allocation3]  }
  0xe6   :  { %153 = dma.done.wait [#allocation3], 128  }
  0xe7   :  { %154 = vsyncadd [#allocation3], 4294967168 }
  0xe8   :  { %108 = vsyncpa [#allocation3], 1 }

</bundles_post_ra>
